<compile_context>
chip_gen: v6e
topology: v6e:2x2x1
jax: 0.10.0
libtpu: 0.0.40
codegen_flags: <defaults>
</compile_context>

<pallas_src>
import functools

import jax
import jax.numpy as jnp
from jax.experimental import pallas as pl
from jax.experimental.pallas import tpu as pltpu


# ---------------- Pallas kernel ----------------

def _leaky_relu(x, slope=0.2):
    return jnp.where(x > 0, x, slope * x)


def conv_res_kernel(x_ref, wf_ref, bf_ref, w2_ref, b2_ref, w3_ref, b3_ref,
                    out_ref, *, c_out):
    # x_ref: (C_in, TM) bf16   weights: (out_ch, in_ch) f32   biases: (out_ch, 1) f32
    x = x_ref[...].astype(jnp.float32)

    # Stage 1: shortcut and conv1 fused into one matmul on the shared input x.
    first = jnp.dot(wf_ref[...], x, preferred_element_type=jnp.float32) + bf_ref[...]
    sc = first[:c_out]                      # (C_out, TM)  conv_shortcut(x)
    h = _leaky_relu(first[c_out:])          # (Hd,   TM)  conv1 + LeakyReLU(0.2)

    # conv2[0] + LeakyReLU(0.2)
    h = jnp.dot(w2_ref[...], h, preferred_element_type=jnp.float32) + b2_ref[...]
    h = _leaky_relu(h)

    # conv2[2]
    h = jnp.dot(w3_ref[...], h, preferred_element_type=jnp.float32) + b3_ref[...]

    # residual add, store bf16 (lane-dense block -> unmasked vst)
    out_ref[...] = (h + sc).astype(out_ref.dtype)


# ---------------- wrapper ----------------

def conv_res_forward(x, params, *, tile=4096, io_dtype=jnp.bfloat16):
    """CONV_Res.forward.

    x: (B, C_in, H, W)  (1x1 convs => pointwise over channels)
    returns (B, C_out, H, W) in `io_dtype`.
    """
    B, C_in, H, W = x.shape
    C_out = params["w_sc"].shape[0]
    Hd = params["w1"].shape[0]
    HW = H * W

    # Lane tile: always a multiple of 128 (or the full spatial extent when it
    # is smaller than a vreg row), ragged last block handled by a cdiv grid.
    if HW <= 128:
        TM = HW
    else:
        TM = max(128, min((tile // 128) * 128, pl.cdiv(HW, 128) * 128))
        # Keep >=2 grid steps so v7x's two TensorCores both get work.
        if B * pl.cdiv(HW, TM) < 2 and HW > 2 * 128:
            TM = pl.cdiv(pl.cdiv(HW, 2), 128) * 128
    grid = (B, pl.cdiv(HW, TM))

    # Free reshape; bf16 over HBM halves traffic for the memory-bound kernel.
    x3 = x.reshape(B, C_in, HW).astype(io_dtype)

    # Shortcut and conv1 consume the same input -> stack their weights/biases.
    w_first = jnp.concatenate([params["w_sc"], params["w1"]], axis=0)   # (C_out+Hd, C_in)
    b_first = jnp.concatenate([params["b_sc"], params["b1"]], axis=0)   # (C_out+Hd, 1)

    # Grid-invariant weight/bias blocks (stay resident in VMEM across steps).
    wspec = lambda shape: pl.BlockSpec(shape, lambda b, m: (0, 0))

    out3 = pl.pallas_call(
        functools.partial(conv_res_kernel, c_out=C_out),
        out_shape=jax.ShapeDtypeStruct((B, C_out, HW), io_dtype),
        grid=grid,
        in_specs=[
            pl.BlockSpec((None, C_in, TM), lambda b, m: (b, 0, m)),  # x tile
            wspec((C_out + Hd, C_in)), wspec((C_out + Hd, 1)),       # shortcut+conv1
            wspec((C_out, Hd)),        wspec((C_out, 1)),            # conv2[0]
            wspec((C_out, C_out)),     wspec((C_out, 1)),            # conv2[2]
        ],
        out_specs=pl.BlockSpec((None, C_out, TM), lambda b, m: (b, 0, m)),
        compiler_params=pltpu.CompilerParams(
            dimension_semantics=("parallel", "parallel")),
    )(x3, w_first, b_first, params["w2"], params["b2"],
      params["w3"], params["b3"])

    return out3.reshape(B, C_out, H, W)


# ---------------- reference (pure JAX) for a sanity check ----------------

def conv_res_reference(x, params):
    def conv1x1(w, b, t):
        return jnp.einsum("oc,bchw->bohw", w, t) + b.reshape(1, -1, 1, 1)

    lrelu = lambda t: jnp.where(t > 0, t, 0.2 * t)
    sc = conv1x1(params["w_sc"], params["b_sc"], x)
    h = lrelu(conv1x1(params["w1"], params["b1"], x))
    h = lrelu(conv1x1(params["w2"], params["b2"], h))
    h = conv1x1(params["w3"], params["b3"], h)
    return h + sc


# ---------------- main ----------------

if __name__ == "__main__":
    key = jax.random.PRNGKey(0)
    B, H, W = 2, 16, 16                       # HW = 256 lanes per batch
    input_size, hide_size, output_size = 10, 16, 32

    ks = jax.random.split(key, 9)
    x = jax.random.normal(ks[0], (B, input_size, H, W), dtype=jnp.float32)

    # 1x1 Conv2d weights flattened to (out_ch, in_ch); biases as (out_ch, 1).
    params = {
        "w_sc": 0.1 * jax.random.normal(ks[1], (output_size, input_size), jnp.float32),
        "b_sc": 0.1 * jax.random.normal(ks[2], (output_size, 1), jnp.float32),
        "w1":   0.1 * jax.random.normal(ks[3], (hide_size, input_size), jnp.float32),
        "b1":   0.1 * jax.random.normal(ks[4], (hide_size, 1), jnp.float32),
        "w2":   0.1 * jax.random.normal(ks[5], (output_size, hide_size), jnp.float32),
        "b2":   0.1 * jax.random.normal(ks[6], (output_size, 1), jnp.float32),
        "w3":   0.1 * jax.random.normal(ks[7], (output_size, output_size), jnp.float32),
        "b3":   0.1 * jax.random.normal(ks[8], (output_size, 1), jnp.float32),
    }

    out = conv_res_forward(x, params)
    jax.block_until_ready(out)

    # Reference on the same bf16-rounded input (isolates kernel error from the
    # intentional bf16 I/O quantization of x); out itself is bf16, so compare
    # with a tolerance that covers one bf16 rounding of the result.
    x_q = x.astype(jnp.bfloat16).astype(jnp.float32)
    ref = conv_res_reference(x_q, params)
    out_f32 = out.astype(jnp.float32)

    assert out.shape == (B, output_size, H, W)
    err = float(jnp.max(jnp.abs(out_f32 - ref)))
    assert jnp.allclose(out_f32, ref, atol=2e-2, rtol=2e-2), err

    print("KERNEL_OK")
</pallas_src>

<mosaic_0001>
module attributes {stable_mosaic.version = 11 : i64} {
  func.func @conv_res_kernel(%arg0: i32, %arg1: i32, %arg2: memref<1x10x256xbf16, #tpu.memory_space<vmem>>, %arg3: memref<48x10xf32, #tpu.memory_space<vmem>>, %arg4: memref<48x1xf32, #tpu.memory_space<vmem>>, %arg5: memref<32x16xf32, #tpu.memory_space<vmem>>, %arg6: memref<32x1xf32, #tpu.memory_space<vmem>>, %arg7: memref<32x32xf32, #tpu.memory_space<vmem>>, %arg8: memref<32x1xf32, #tpu.memory_space<vmem>>, %arg9: memref<1x32x256xbf16, #tpu.memory_space<vmem>>) attributes {dimension_semantics = [#tpu.dimension_semantics<parallel>, #tpu.dimension_semantics<parallel>], iteration_bounds = array<i64: 2, 1>, scalar_prefetch = 0 : i64, scratch_operands = 0 : i64, tpu.core_type = #tpu.core_type<tc>, window_params = [{transform_indices = @transform_0, window_bounds = array<i64: 1, 10, 256>}, {pipeline_mode = #tpu.pipeline_mode<synchronous>, transform_indices = @transform_1, window_bounds = array<i64: 48, 10>}, {pipeline_mode = #tpu.pipeline_mode<synchronous>, transform_indices = @transform_2, window_bounds = array<i64: 48, 1>}, {pipeline_mode = #tpu.pipeline_mode<synchronous>, transform_indices = @transform_3, window_bounds = array<i64: 32, 16>}, {pipeline_mode = #tpu.pipeline_mode<synchronous>, transform_indices = @transform_4, window_bounds = array<i64: 32, 1>}, {pipeline_mode = #tpu.pipeline_mode<synchronous>, transform_indices = @transform_5, window_bounds = array<i64: 32, 32>}, {pipeline_mode = #tpu.pipeline_mode<synchronous>, transform_indices = @transform_6, window_bounds = array<i64: 32, 1>}, {transform_indices = @transform_7, window_bounds = array<i64: 1, 32, 256>}]} {
    %c0 = arith.constant 0 : index
    %c0_0 = arith.constant 0 : index
    %c0_1 = arith.constant 0 : index
    %0 = vector.load %arg2[%c0, %c0_0, %c0_1] : memref<1x10x256xbf16, #tpu.memory_space<vmem>>, vector<1x10x256xbf16>
    %1 = vector.shape_cast %0 : vector<1x10x256xbf16> to vector<10x256xbf16>
    %2 = arith.extf %1 : vector<10x256xbf16> to vector<10x256xf32>
    %c0_2 = arith.constant 0 : index
    %c0_3 = arith.constant 0 : index
    %3 = vector.load %arg3[%c0_2, %c0_3] : memref<48x10xf32, #tpu.memory_space<vmem>>, vector<48x10xf32>
    %cst = arith.constant dense<0.000000e+00> : vector<48x256xf32>
    %4 = tpu.matmul %3, %2, %cst {dimension_numbers = #tpu.dot_dimension_numbers<[1], [0], [0], [1], [0, 0, 1, 1], [], []>} : vector<48x10xf32>, vector<10x256xf32>, vector<48x256xf32> -> vector<48x256xf32>
    %c0_4 = arith.constant 0 : index
    %c0_5 = arith.constant 0 : index
    %5 = vector.load %arg4[%c0_4, %c0_5] : memref<48x1xf32, #tpu.memory_space<vmem>>, vector<48x1xf32>
    %6 = vector.broadcast %5 : vector<48x1xf32> to vector<48x256xf32>
    %7 = arith.addf %4, %6 : vector<48x256xf32>
    %8 = vector.extract_strided_slice %7 {offsets = [0, 0], sizes = [32, 256], strides = [1, 1]} : vector<48x256xf32> to vector<32x256xf32>
    %9 = vector.extract_strided_slice %7 {offsets = [32, 0], sizes = [16, 256], strides = [1, 1]} : vector<48x256xf32> to vector<16x256xf32>
    %cst_6 = arith.constant 0.000000e+00 : f32
    %10 = vector.broadcast %cst_6 : f32 to vector<16x256xf32>
    %11 = arith.cmpf ogt, %9, %10 : vector<16x256xf32>
    %cst_7 = arith.constant 2.000000e-01 : f32
    %12 = vector.broadcast %cst_7 : f32 to vector<16x256xf32>
    %13 = arith.mulf %12, %9 : vector<16x256xf32>
    %14 = arith.select %11, %9, %13 : vector<16x256xi1>, vector<16x256xf32>
    %c0_8 = arith.constant 0 : index
    %c0_9 = arith.constant 0 : index
    %15 = vector.load %arg5[%c0_8, %c0_9] : memref<32x16xf32, #tpu.memory_space<vmem>>, vector<32x16xf32>
    %cst_10 = arith.constant dense<0.000000e+00> : vector<32x256xf32>
    %16 = tpu.matmul %15, %14, %cst_10 {dimension_numbers = #tpu.dot_dimension_numbers<[1], [0], [0], [1], [0, 0, 1, 1], [], []>} : vector<32x16xf32>, vector<16x256xf32>, vector<32x256xf32> -> vector<32x256xf32>
    %c0_11 = arith.constant 0 : index
    %c0_12 = arith.constant 0 : index
    %17 = vector.load %arg6[%c0_11, %c0_12] : memref<32x1xf32, #tpu.memory_space<vmem>>, vector<32x1xf32>
    %18 = vector.broadcast %17 : vector<32x1xf32> to vector<32x256xf32>
    %19 = arith.addf %16, %18 : vector<32x256xf32>
    %cst_13 = arith.constant 0.000000e+00 : f32
    %20 = vector.broadcast %cst_13 : f32 to vector<32x256xf32>
    %21 = arith.cmpf ogt, %19, %20 : vector<32x256xf32>
    %cst_14 = arith.constant 2.000000e-01 : f32
    %22 = vector.broadcast %cst_14 : f32 to vector<32x256xf32>
    %23 = arith.mulf %22, %19 : vector<32x256xf32>
    %24 = arith.select %21, %19, %23 : vector<32x256xi1>, vector<32x256xf32>
    %c0_15 = arith.constant 0 : index
    %c0_16 = arith.constant 0 : index
    %25 = vector.load %arg7[%c0_15, %c0_16] : memref<32x32xf32, #tpu.memory_space<vmem>>, vector<32x32xf32>
    %cst_17 = arith.constant dense<0.000000e+00> : vector<32x256xf32>
    %26 = tpu.matmul %25, %24, %cst_17 {dimension_numbers = #tpu.dot_dimension_numbers<[1], [0], [0], [1], [0, 0, 1, 1], [], []>} : vector<32x32xf32>, vector<32x256xf32>, vector<32x256xf32> -> vector<32x256xf32>
    %c0_18 = arith.constant 0 : index
    %c0_19 = arith.constant 0 : index
    %27 = vector.load %arg8[%c0_18, %c0_19] : memref<32x1xf32, #tpu.memory_space<vmem>>, vector<32x1xf32>
    %28 = vector.broadcast %27 : vector<32x1xf32> to vector<32x256xf32>
    %29 = arith.addf %26, %28 : vector<32x256xf32>
    %30 = arith.addf %29, %8 : vector<32x256xf32>
    %31 = arith.truncf %30 : vector<32x256xf32> to vector<32x256xbf16>
    %c0_20 = arith.constant 0 : index
    %c0_21 = arith.constant 0 : index
    %c0_22 = arith.constant 0 : index
    %32 = vector.load %arg9[%c0_20, %c0_21, %c0_22] : memref<1x32x256xbf16, #tpu.memory_space<vmem>>, vector<1x32x256xbf16>
    %33 = vector.shape_cast %32 : vector<1x32x256xbf16> to vector<32x256xbf16>
    %34 = vector.shape_cast %31 : vector<32x256xbf16> to vector<1x32x256xbf16>
    tpu.vector_store %arg9[%c0_20, %c0_21, %c0_22], %34 {strides = array<i32>} : memref<1x32x256xbf16, #tpu.memory_space<vmem>>, vector<1x32x256xbf16>,
    return
  }
  func.func @transform_0(%arg0: i32, %arg1: i32) -> (i32, i32, i32) {
    %c0_i32 = arith.constant 0 : i32
    %c0_i32_0 = arith.constant 0 : i32
    return %arg0, %c0_i32, %arg1 : i32, i32, i32
  }
  func.func @transform_1(%arg0: i32, %arg1: i32) -> (i32, i32) {
    %c0_i32 = arith.constant 0 : i32
    %c0_i32_0 = arith.constant 0 : i32
    %c0_i32_1 = arith.constant 0 : i32
    return %c0_i32, %c0_i32_0 : i32, i32
  }
  func.func @transform_2(%arg0: i32, %arg1: i32) -> (i32, i32) {
    %c0_i32 = arith.constant 0 : i32
    %c0_i32_0 = arith.constant 0 : i32
    %c0_i32_1 = arith.constant 0 : i32
    return %c0_i32, %c0_i32_0 : i32, i32
  }
  func.func @transform_3(%arg0: i32, %arg1: i32) -> (i32, i32) {
    %c0_i32 = arith.constant 0 : i32
    %c0_i32_0 = arith.constant 0 : i32
    %c0_i32_1 = arith.constant 0 : i32
    return %c0_i32, %c0_i32_0 : i32, i32
  }
  func.func @transform_4(%arg0: i32, %arg1: i32) -> (i32, i32) {
    %c0_i32 = arith.constant 0 : i32
    %c0_i32_0 = arith.constant 0 : i32
    %c0_i32_1 = arith.constant 0 : i32
    return %c0_i32, %c0_i32_0 : i32, i32
  }
  func.func @transform_5(%arg0: i32, %arg1: i32) -> (i32, i32) {
    %c0_i32 = arith.constant 0 : i32
    %c0_i32_0 = arith.constant 0 : i32
    %c0_i32_1 = arith.constant 0 : i32
    return %c0_i32, %c0_i32_0 : i32, i32
  }
  func.func @transform_6(%arg0: i32, %arg1: i32) -> (i32, i32) {
    %c0_i32 = arith.constant 0 : i32
    %c0_i32_0 = arith.constant 0 : i32
    %c0_i32_1 = arith.constant 0 : i32
    return %c0_i32, %c0_i32_0 : i32, i32
  }
  func.func @transform_7(%arg0: i32, %arg1: i32) -> (i32, i32, i32) {
    %c0_i32 = arith.constant 0 : i32
    %c0_i32_0 = arith.constant 0 : i32
    return %arg0, %c0_i32, %arg1 : i32, i32, i32
  }
}

</mosaic_0001>

<bundles_post_ra>
// kernel: tpu_custom_call.1
= control target key start
LH: loop header
LB: loop body
LE: loop exit
PB: predicated region body
PF: predicated region fallthrough
CT: control target
= control target key end

     0   :  { %12 = vsyncpa [#allocation3], 0  ;;  %s1383_s0 = inlined_call_operand.vmem [shape: bf16[2,10,256], index: 0, kind: input, shape index: {}]   ;;  %s1384_s1 = inlined_call_operand.vmem [shape: f32[48,10], index: 1, kind: input, shape index: {}]   ;;  %s1385_s2 = inlined_call_operand.vmem [shape: f32[48,1], index: 2, kind: input, shape index: {}]   ;;  %s1386_s3 = inlined_call_operand.vmem [shape: f32[32,16], index: 3, kind: input, shape index: {}]   ;;  %s1387_s4 = inlined_call_operand.vmem [shape: f32[32,1], index: 4, kind: input, shape index: {}]   ;;  %s1388_s5 = inlined_call_operand.vmem [shape: f32[32,32], index: 5, kind: input, shape index: {}]   ;;  %s1389_s6 = inlined_call_operand.vmem [shape: f32[32,1], index: 6, kind: input, shape index: {}]   ;;  %s1390_s7 = inlined_call_operand.hbm [shape: bf16[2,32,256], index: 7, kind: output, shape index: {}]  }
   0x1   :  { %14 = vsyncpa [#allocation3 + $0x1], 0  ;;  %s1137_s24 = smov 0   ;;  %s1139_s25 = smov 0  }
   0x2   :  { %s1141_s26 = smov 0   ;;  %s1143_s27 = smov 0  }
   0x3   :  { %s1145_s28 = smov 0   ;;  %s1147_s29 = smov 0  }
   0x4 LB: > { %s910_s30 = sadd.s32 4294967295, %s1090_s29   ;;  %s911_s8 = sadd.s32 4294967294, %s1090_s29   ;;  %s1090_s29 = sphi %s1147_s29, %s20_s29   ;;  %s1086_s28 = sphi %s1145_s28, %s1397_s28   ;;  %s1082_s27 = sphi %s1143_s27, %s1396_s27   ;;  %s1078_s26 = sphi %s1141_s26, %s1395_s26   ;;  %s1074_s25 = sphi %s1139_s25, %s1394_s25   ;;  %s1070_s24 = sphi %s1137_s24, %s1393_s24  }
   0x5   : > { %s32_s9 = sadd.s32 1, %s1086_s28  ;;  %s195_s10 = sadd.s32 1, %s1078_s26 }
   0x6   : > { %p34_p0 = scmp.ge.s32.totalorder %s32_s9, 2  ;;  %p205_p1 = scmp.ne.s32.totalorder %s1078_s26, %s1074_s25 }
   0x7   : > { %p206_p2 = scmp.eq.s32.totalorder %s910_s30, 1  ;;  %p211_p3 = scmp.ne.s32.totalorder %s1074_s25, %s1070_s24 }
   0x8   : > { %s1399_s9 = smov (%p34_p0, %s32_s9), 0  ;;  %p212_p5 = scmp.eq.s32.totalorder %s911_s8, 1 }
   0x9   : > { %p1177_p4 = por %p206_p2, %p205_p1  ;;  %s190_s12 = ssub.s32 %s1086_s28, %s1399_s9 }
   0xa   : > { %p914_p6 = scmp.ge.s32.totalorder %s1090_s29, 1  ;;  %p193_p7 = scmp.eq.s32.totalorder %s190_s12, 0 }
   0xb   : > { %p1184_p8 = por %p212_p5, %p211_p3  ;;  %p261_p9 = scmp.lt.s32.totalorder %s1090_s29, 3 }
   0xc   : > { %s1190_s14 = scalar_select %p193_p7, %s1078_s26, %s195_s10  }
   0xd   : > { %p262_p10 = pnand %p914_p6, %p261_p9 }
   0xe   : > { %p298_p11 = scmp.lt.s32.totalorder (!%p262_p10), %s1082_s27, 1  ;;  %s294_s30 = sand.u32 (!%p262_p10), 1, %s1074_s25  }
   0xf   : > { %265 = sbr.rel (%p262_p10) target bundleno = 699 (0x2bb), region = 48  ;;  %s915_s8 = sshll.u32 (!%p262_p10), %s294_s30, 5 }
  0x10   : > { %s296_s10 = scalar_lea.vmem (!%p262_p10), [#allocation2], %s915_s8  ;;  %s1338_s19 = scalar_lea.sflag (!%p262_p10), [#allocation3], %s294_s30 }
  0x14   : > { %v1092_v0 = vmov 0.0   ;;  %s299_s15 = scalar_select %p298_p11, %s1082_s27, 1  ;;  %v1093_v1 = vmov 0   ;;  %v325_v2 = vld [vmem:[%s1385_s2 + $0x28] sm:$0xff]  ;;  %v502_v3 = vld [vmem:[%s1387_s4 + $0x18] sm:$0xff]  ;;  %v324_v4 = vld [vmem:[%s1385_s2 + $0x20] sm:$0xff] }
  0x15   : > { %446 = vmatprep.mubr.f32.mxu0 %v1092_v0  ;;  %606 = vmatprep.mubr.f32.mxu1 %v1092_v0  ;;  %v501_v5 = vld [vmem:[%s1387_s4 + $0x10] sm:$0xff]  ;;  %vm375_vm0 = vcmask 1041408   ;;  %v500_v12 = vld [vmem:[%s1387_s4 + $0x8] sm:$0xff]  ;;  %v499_v13 = vld [vmem:[%s1387_s4] sm:$0xff]  ;;  %vm356_vm1 = vcmask 80896   ;;  %vm523_vm6 = vcmask 130048  }
  0x16   : > { %1012 = vset.pattern.permute.xlu0 %v1093_v1  ;;  %1013 = vset.pattern.permute.xlu1 %v1093_v1  ;;  %s943_s20 = sshll.u32 %s299_s15, 4  ;;  %v314_v14 = vld [vmem:[%s1384_s1] sm:$0xff]  ;;  %v321_v16 = vld [vmem:[%s1385_s2 + $0x8] sm:$0xff]  ;;  %v322_v18 = vld [vmem:[%s1385_s2 + $0x10] sm:$0xff]  ;;  %vm677_vm15 = vcmask 261120   ;;  %s948_s15 = sshll.u32 %s1082_s27, 9 }
  0x17   : > { %353 = vperm.xlu0 %1012, %v325_v2   ;;  %520 = vperm.xlu1 %1013, %v502_v3   ;;  %s305_s12 = scalar_lea.vmem %s1383_s0, %s943_s20  ;;  %v320_v15 = vld [vmem:[%s1385_s2] sm:$0xff]  ;;  %v315_v17 = vld [vmem:[%s1384_s1 + $0x8] sm:$0xff]  ;;  %v323_v19 = vld [vmem:[%s1385_s2 + $0x18] sm:$0xff]  ;;  %s1334_s18 = scalar_lea.hbm %s1390_s7, %s948_s15 }
  0x18   : > { %v308_v6 = vld [vmem:[%s305_s12] sm:$0xff]  ;;  %v309_v7 = vld [vmem:[%s305_s12 + $0x8] sm:$0x11]  ;;  %v316_v20 = vld [vmem:[%s1384_s1 + $0x10] sm:$0xff]  ;;  %s831_s12 = sshll.u32 %s296_s10, 4  ;;  %s1094_s27 = smov [#allocation2]   ;;  %s1329_s12 = int_to_ptr.vmem [resolvable:$true] %s831_s12 }
  0x19   : > { %v312_v8 = vunpack.c.l.bf16 %v309_v7  ;;  %v313_v9 = vunpack.c.h.bf16 %v309_v7  ;;  %v311_v10 = vunpack.c.h.bf16 %v308_v6  ;;  %v310_v11 = vunpack.c.l.bf16 %v308_v6  ;;  %v653_v21 = vld [vmem:[%s1389_s6] sm:$0xff]  ;;  %v317_v22 = vld [vmem:[%s1384_s1 + $0x18] sm:$0xff]  ;;  %v655_v23 = vld [vmem:[%s1389_s6 + $0x10] sm:$0xff]  ;;  %s1014_s20 = scalar_lea.vmem %s1329_s12, 512  ;;  %s1018_s21 = sshll.u32 %s1094_s27, 4  ;;  %s1019_s21 = int_to_ptr.vmem [resolvable:$false] %s1018_s21 }
  0x1a   : > { %v318_v24 = vld [vmem:[%s1384_s1 + $0x20] sm:$0xff]  ;;  %v319_v25 = vld [vmem:[%s1384_s1 + $0x28] sm:$0xff]  ;;  %v656_v27 = vld [vmem:[%s1389_s6 + $0x18] sm:$0xff]  ;;  %p1015_p12 = scmp.ne.s32.totalorder %s1329_s12, %s1014_s20  ;;  %s1020_s22 = scalar_lea.vmem %s1019_s21, 1024 }
  0x1b   : > { %348 = vperm.xlu0 %1012, %v324_v4   ;;  %515 = vperm.xlu1 %1013, %v501_v5   ;;  %v654_v26 = vld [vmem:[%s1389_s6 + $0x8] sm:$0xff]  ;;  %v495_v54 = vld [vmem:[%s1386_s3] sm:$0xff]  ;;  %v497_v56 = vld [vmem:[%s1386_s3 + $0x10] sm:$0xff]  ;;  %p1021_p1 = scmp.lt.s32.totalorder %s1329_s12, %s1019_s21  ;;  %p1022_p2 = scmp.lt.s32.totalorder %s1020_s22, %s1014_s20 }
  0x1c   : > { %918 = vmatprep.subr.msk.mxu0 %vm375_vm0, %v313_v9  ;;  %v496_v53 = vld [vmem:[%s1386_s3 + $0x8] sm:$0xff]  ;;  %v498_v57 = vld [vmem:[%s1386_s3 + $0x18] sm:$0xff]  ;;  %p1016_p13 = pnand %p1015_p12, %p1177_p4 }
  0x1d   : > { %919 = vmatpush1.msk.msra.mxu0 %vm375_vm0, %v312_v8  ;;  %p1023_p3 = por %p1022_p2, %p1021_p1 }
  0x1e   : > { %412 = vmatprep.subr.mxu0 %v311_v10  ;;  %p1017_p0 = pneg %p1016_p13 }
  0x1f   : > { %510 = vperm.xlu0 %1012, %v500_v12   ;;  %413 = vmatpush1.msra.mxu0 %v310_v11 }
  0x20   : > { %505 = vperm.xlu1 %1013, %v499_v13   ;;  %920 = vmatmul.mubr.msk.f32.vlgmr.msra.gmra.mxu0 %vm356_vm1, %v314_v14  ;;  %p1024_p5 = pnand %p1023_p3, %p1017_p0 }
  0x21   : > { %452 = vmatprep.mubr.f32.mxu0 %v1092_v0 }
  0x23   : > { %328 = vperm.xlu0 %1012, %v320_v15  }
  0x24   : > { %333 = vperm.xlu1 %1013, %v321_v16   ;;  %921 = vmatmul.mubr.msk.f32.gmra.mxu0 %vm356_vm1, %v315_v17 }
  0x25   : > { %458 = vmatprep.mubr.f32.mxu0 %v1092_v0 }
  0x27   : > { %338 = vperm.xlu0 %1012, %v322_v18  }
  0x28   : > { %343 = vperm.xlu1 %1013, %v323_v19   ;;  %922 = vmatmul.mubr.msk.f32.gmra.mxu0 %vm356_vm1, %v316_v20 }
  0x29   : > { %464 = vmatprep.mubr.f32.mxu0 %v1092_v0 }
  0x2b   : > { %659 = vperm.xlu0 %1012, %v653_v21  }
  0x2c   : > { %923 = vmatmul.mubr.msk.f32.gmra.mxu0 %vm356_vm1, %v317_v22  ;;  %664 = vperm.xlu1 %1013, %v654_v26  }
  0x2d   : > { %470 = vmatprep.mubr.f32.mxu0 %v1092_v0 }
  0x2f   : > { %669 = vperm.xlu0 %1012, %v655_v23  }
  0x30   : > { %924 = vmatmul.mubr.msk.f32.gmra.mxu0 %vm356_vm1, %v318_v24  ;;  %674 = vperm.xlu1 %1013, %v656_v27  }
  0x31   : > { %476 = vmatprep.mubr.f32.mxu0 %v1092_v0 }
  0x34   : > { %925 = vmatmul.mubr.msk.f32.gmra.mxu0 %vm356_vm1, %v319_v25 }
  0x35   : > { %600 = vmatprep.mubr.f32.mxu0 %v1092_v0 }
  0x92   : > { %v354_v35 = vpop.permute.xlu0 %353  ;;  %v521_v58 = vpop.permute.xlu1 %520 }
  0x96   : > { %v349_v39 = vpop.permute.xlu0 %348  ;;  %v516_v62 = vpop.permute.xlu1 %515 }
  0x9a   : > { %v511_v6 = vpop.permute.xlu0 %510 }
  0x9b   : > { %v506_v9 = vpop.permute.xlu1 %505 }
  0xe0   : > { %v1271_v28 = vpop.f32.mrf.mxu0 }
  0xe2   : > { %v1273_v29 = vpop.f32.mrf.mxu0 }
  0xe4   : > { %v1275_v30 = vpop.f32.mrf.mxu0 }
  0xe6   : > { %v1277_v31 = vpop.f32.mrf.mxu0 }
  0xe8   : > { %v1279_v32 = vpop.f32.mrf.mxu0 }
  0xea   : > { %v1281_v33 = vpop.f32.mrf.mxu0 }
  0xec   : > { %v1283_v34 = vpop.f32.mrf.mxu0 }
  0xee   : > { %v1285_v36 = vpop.f32.mrf.mxu0 }
  0xf0   : > { %v472_v37 = vpop.f32.mrf.mxu0 }
  0xf1   : > { %v473_v43 = vadd.f32 %v472_v37, %v349_v39 }
  0xf2   : > { %v474_v38 = vpop.f32.mrf.mxu0 }
  0xf3   : > { %v475_v41 = vadd.f32 %v474_v38, %v349_v39  ;;  %v487_v49 = vmul.f32 0.2, %v473_v43  ;;  %vm483_vm5 = vcmp.gt.f32.partialorder %v473_v43, 0.0  ;;  %v649_v38 = vld [vmem:[%s1388_s5] sm:$0xff] }
  0xf4   : > { %v478_v40 = vpop.f32.mrf.mxu0 }
  0xf5   : > { %v479_v42 = vadd.f32 %v478_v40, %v354_v35  ;;  %v488_v47 = vmul.f32 0.2, %v475_v41  ;;  %vm484_vm4 = vcmp.gt.f32.partialorder %v475_v41, 0.0  ;;  %v491_v55 = vsel %vm483_vm5, %v473_v43, %v487_v49  ;;  %v650_v40 = vld [vmem:[%s1388_s5 + $0x8] sm:$0xff]  ;;  %v329_v43 = vpop.permute.xlu0 %328 }
  0xf6   : > { %v480_v44 = vpop.f32.mrf.mxu0 }
  0xf7   : > { %v481_v45 = vadd.f32 %v480_v44, %v354_v35  ;;  %v489_v46 = vmul.f32 0.2, %v479_v42  ;;  %vm485_vm2 = vcmp.gt.f32.partialorder %v479_v42, 0.0  ;;  %v492_v52 = vsel %vm484_vm4, %v475_v41, %v488_v47  ;;  %v651_v41 = vld [vmem:[%s1388_s5 + $0x10] sm:$0xff]  ;;  %v334_v44 = vpop.permute.xlu1 %333 }
  0xf9   : > { %v490_v48 = vmul.f32 0.2, %v481_v45  ;;  %vm486_vm3 = vcmp.gt.f32.partialorder %v481_v45, 0.0  ;;  %v493_v51 = vsel %vm485_vm2, %v479_v42, %v489_v46  ;;  %v652_v42 = vld [vmem:[%s1388_s5 + $0x18] sm:$0xff] }
  0xfb   : > { %v494_v50 = vsel %vm486_vm3, %v481_v45, %v490_v48  ;;  %v339_v45 = vpop.permute.xlu0 %338  ;;  %v344_v46 = vpop.permute.xlu1 %343 }
  0xfc   : > { %564 = vmatprep.subr.mxu0 %v494_v50  ;;  %949 = vmatprep.subr.mxu1 %v494_v50 }
  0xfd   : > { %565 = vmatpush1.msra.mxu0 %v493_v51  ;;  %951 = vmatpush1.msra.mxu1 %v493_v51  ;;  %v449_v51 = vadd.f32 %v1271_v28, %v329_v43 }
  0xfe   : > { %566 = vmatprep.subr.mxu0 %v492_v52  ;;  %950 = vmatprep.subr.mxu1 %v492_v52  ;;  %v451_v52 = vadd.f32 %v1273_v29, %v329_v43 }
  0xff   : > { %567 = vmatpush1.msra.mxu0 %v491_v55  ;;  %952 = vmatpush1.msra.mxu1 %v491_v55  ;;  %v660_v47 = vpop.permute.xlu0 %659 }
 0x100   : > { %927 = vmatmul.mubr.msk.f32.vlgmr.msra.gmra.mxu1 %vm523_vm6, %v496_v53  ;;  %926 = vmatmul.mubr.msk.f32.vlgmr.msra.gmra.mxu0 %vm523_vm6, %v495_v54  ;;  %v665_v53 = vpop.permute.xlu1 %664 }
 0x101   : > { %612 = vmatprep.mubr.f32.mxu1 %v1092_v0 }
 0x104   : > { %928 = vmatmul.mubr.msk.f32.gmra.mxu1 %vm523_vm6, %v497_v56 }
 0x105   : > { %618 = vmatprep.mubr.f32.mxu1 %v1092_v0 }
 0x108   : > { %929 = vmatmul.mubr.msk.f32.gmra.mxu1 %vm523_vm6, %v498_v57 }
 0x109   : > { %754 = vmatprep.mubr.f32.mxu1 %v1092_v0 }
 0x1c0   : > { %v608_v59 = vpop.f32.mrf.mxu1  ;;  %v602_v63 = vpop.f32.mrf.mxu0 }
 0x1c1   : > { %v609_v12 = vadd.f32 %v608_v59, %v511_v6  ;;  %v603_v18 = vadd.f32 %v602_v63, %v506_v9  ;;  %v455_v59 = vadd.f32 %v1275_v30, %v334_v44  ;;  %v670_v63 = vpop.permute.xlu0 %669  ;;  %v675_v30 = vpop.permute.xlu1 %674 }
 0x1c2   : > { %v610_v60 = vpop.f32.mrf.mxu1  ;;  %v604_v5 = vpop.f32.mrf.mxu0 }
 0x1c3   : > { %v611_v10 = vadd.f32 %v610_v60, %v511_v6  ;;  %v605_v14 = vadd.f32 %v604_v5, %v506_v9  ;;  %v635_v21 = vmul.f32 0.2, %v609_v12  ;;  %vm627_vm12 = vcmp.gt.f32.partialorder %v609_v12, 0.0 }
 0x1c4   : > { %v614_v61 = vpop.f32.mrf.mxu1  ;;  %v633_v25 = vmul.f32 0.2, %v603_v18  ;;  %vm625_vm14 = vcmp.gt.f32.partialorder %v603_v18, 0.0  ;;  %v457_v60 = vadd.f32 %v1277_v31, %v334_v44  ;;  %v463_v5 = vadd.f32 %v1281_v33, %v339_v45 }
 0x1c5   : > { %v615_v7 = vadd.f32 %v614_v61, %v516_v62  ;;  %v636_v19 = vmul.f32 0.2, %v611_v10  ;;  %vm628_vm11 = vcmp.gt.f32.partialorder %v611_v10, 0.0  ;;  %v634_v23 = vmul.f32 0.2, %v605_v14 }
 0x1c6   : > { %v616_v1 = vpop.f32.mrf.mxu1  ;;  %vm626_vm13 = vcmp.gt.f32.partialorder %v605_v14, 0.0  ;;  %v643_v35 = vsel %vm627_vm12, %v609_v12, %v635_v21  ;;  %v641_v39 = vsel %vm625_vm14, %v603_v18, %v633_v25  ;;  %v467_v12 = vadd.f32 %v1283_v34, %v344_v46 }
 0x1c7   : > { %v617_v3 = vadd.f32 %v616_v1, %v516_v62  ;;  %v637_v17 = vmul.f32 0.2, %v615_v7  ;;  %vm629_vm10 = vcmp.gt.f32.partialorder %v615_v7, 0.0  ;;  %v644_v27 = vsel %vm628_vm11, %v611_v10, %v636_v19 }
 0x1c8   : > { %v620_v2 = vpop.f32.mrf.mxu1  ;;  %v642_v37 = vsel %vm626_vm13, %v605_v14, %v634_v23 }
 0x1c9   : > { %v621_v4 = vadd.f32 %v620_v2, %v521_v58  ;;  %v638_v15 = vmul.f32 0.2, %v617_v3  ;;  %vm630_vm9 = vcmp.gt.f32.partialorder %v617_v3, 0.0  ;;  %v645_v26 = vsel %vm629_vm10, %v615_v7, %v637_v17 }
 0x1ca   : > { %v622_v8 = vpop.f32.mrf.mxu1 }
 0x1cb   : > { %v623_v11 = vadd.f32 %v622_v8, %v521_v58  ;;  %v639_v13 = vmul.f32 0.2, %v621_v4  ;;  %vm631_vm7 = vcmp.gt.f32.partialorder %v621_v4, 0.0  ;;  %v646_v24 = vsel %vm630_vm9, %v617_v3, %v638_v15 }
 0x1cd   : > { %v640_v16 = vmul.f32 0.2, %v623_v11  ;;  %vm632_vm8 = vcmp.gt.f32.partialorder %v623_v11, 0.0  ;;  %v647_v22 = vsel %vm631_vm7, %v621_v4, %v639_v13  ;;  %v461_v4 = vadd.f32 %v1279_v32, %v339_v45 }
 0x1ce   : > { %v469_v13 = vadd.f32 %v1285_v36, %v344_v46 }
 0x1cf   : > { %v648_v20 = vsel %vm632_vm8, %v623_v11, %v640_v16 }
 0x1d0   : > { %714 = vmatprep.subr.mxu1 %v648_v20 }
 0x1d1   : > { %715 = vmatpush1.msra.mxu1 %v647_v22 }
 0x1d2   : > { %716 = vmatprep.subr.mxu1 %v646_v24 }
 0x1d3   : > { %717 = vmatpush1.msra.mxu1 %v645_v26 }
 0x1d4   : > { %718 = vmatprep.subr.mxu1 %v644_v27 }
 0x1d5   : > { %719 = vmatpush1.msra.mxu1 %v643_v35 }
 0x1d6   : > { %720 = vmatprep.subr.mxu1 %v642_v37 }
 0x1d7   : > { %721 = vmatpush1.msra.mxu1 %v641_v39 }
 0x1d8   : > { %930 = vmatmul.mubr.msk.f32.vlgmr.msra.gmra.mxu1 %vm677_vm15, %v649_v38 }
 0x1d9   : > { %760 = vmatprep.mubr.f32.mxu1 %v1092_v0 }
 0x1dc   : > { %931 = vmatmul.mubr.msk.f32.gmra.mxu1 %vm677_vm15, %v650_v40 }
 0x1dd   : > { %766 = vmatprep.mubr.f32.mxu1 %v1092_v0 }
 0x1e0   : > { %932 = vmatmul.mubr.msk.f32.gmra.mxu1 %vm677_vm15, %v651_v41 }
 0x1e1   : > { %772 = vmatprep.mubr.f32.mxu1 %v1092_v0 }
 0x1e4   : > { %933 = vmatmul.mubr.msk.f32.gmra.mxu1 %vm677_vm15, %v652_v42 }
 0x298   : > { %v756_v48 = vpop.f32.mrf.mxu1 }
 0x299   : > { %v757_v49 = vadd.f32 %v756_v48, %v660_v47 }
 0x29a   : > { %v758_v50 = vpop.f32.mrf.mxu1 }
 0x29b   : > { %v759_v0 = vadd.f32 %v758_v50, %v660_v47  ;;  %v779_v55 = vadd.f32 %v757_v49, %v449_v51 }
 0x29c   : > { %v762_v54 = vpop.f32.mrf.mxu1 }
 0x29d   : > { %v780_v56 = vadd.f32 %v759_v0, %v451_v52  ;;  %v763_v57 = vadd.f32 %v762_v54, %v665_v53 }
 0x29e   : > { %v764_v58 = vpop.f32.mrf.mxu1 }
 0x29f   : > { %v944_v61 = vpack.c.bf16 %v780_v56, %v779_v55  ;;  %v765_v62 = vadd.f32 %v764_v58, %v665_v53  ;;  %v781_v28 = vadd.f32 %v763_v57, %v455_v59 }
 0x2a0   : > { %v768_v1 = vpop.f32.mrf.mxu1 }
 0x2a1   : > { %811 = vst [vmem:[%s296_s10] sm:$0xff] %v944_v61  ;;  %v782_v29 = vadd.f32 %v765_v62, %v457_v60  ;;  %v769_v2 = vadd.f32 %v768_v1, %v670_v63 }
 0x2a2   : > { %v770_v3 = vpop.f32.mrf.mxu1 }
 0x2a3   : > { %v945_v6 = vpack.c.bf16 %v782_v29, %v781_v28  ;;  %v771_v7 = vadd.f32 %v770_v3, %v670_v63  ;;  %v783_v31 = vadd.f32 %v769_v2, %v461_v4 }
 0x2a4   : > { %v774_v8 = vpop.f32.mrf.mxu1 }
 0x2a5   : > { %812 = vst [vmem:[%s296_s10 + $0x8] sm:$0xff] %v945_v6  ;;  %v784_v9 = vadd.f32 %v771_v7, %v463_v5  ;;  %v775_v10 = vadd.f32 %v774_v8, %v675_v30 }
 0x2a6   : > { %v776_v11 = vpop.f32.mrf.mxu1 }
 0x2a7   : > { %v946_v32 = vpack.c.bf16 %v784_v9, %v783_v31  ;;  %v777_v14 = vadd.f32 %v776_v11, %v675_v30  ;;  %v785_v33 = vadd.f32 %v775_v10, %v467_v12 }
 0x2a9   : > { %813 = vst [vmem:[%s296_s10 + $0x10] sm:$0xff] %v946_v32  ;;  %v786_v15 = vadd.f32 %v777_v14, %v469_v13 }
 0x2ab   : > { %v947_v34 = vpack.c.bf16 %v786_v15, %v785_v33 }
 0x2ad   : > { %814 = vst [vmem:[%s296_s10 + $0x18] sm:$0xff] %v947_v34 }
 0x2ae   : > { %1027 = shalt.err (!%p1024_p5)
}
 0x2af   : > { %s1028_s23 = scalar_lea.hbm %s1334_s18, 512  ;;  %s1032_s10 = scalar_lea.hbm %s1390_s7, 1024 }
 0x2b0   : > { %p1029_p6 = scmp.ne.s32.totalorder %s1334_s18, %s1028_s23  ;;  %p1033_p10 = scmp.lt.s32.totalorder %s1334_s18, %s1390_s7 }
 0x2b1   : > { %p1034_p11 = scmp.lt.s32.totalorder %s1032_s10, %s1028_s23 }
 0x2b2   : > { %p1030_p7 = pnand %p1029_p6, %p1177_p4 }
 0x2b3   : > { %p1035_p12 = por %p1034_p11, %p1033_p10 }
 0x2b4   : > { %p1031_p9 = pneg %p1030_p7 }
 0x2b6   : > { %p1036_p13 = pnand %p1035_p12, %p1031_p9 }
 0x2b8   : > { %1039 = shalt.err (!%p1036_p13)
}
 0x2b9   : > { %s1095_s17 = smov 128   ;;  %s1096_s20 = smov 8  }
 0x2ba   : > { %953 = dma.vmem_to_hbm [thread:$0]  (%p1177_p4), %s1329_s12, 512, %s1334_s18, %s1338_s19, %s1095_s17, %s1095_s17, %s1096_s20  }
 0x2bb PF: > { %p959_p0 = scmp.ge.s32.totalorder %s1090_s29, 2  ;;  %s846_s27 = sand.u32 1, %s1070_s24  }
 0x2bc   : > { %s847_s21 = scalar_lea.sflag [#allocation3], %s846_s27 }
 0x2bd   : > { %p956_p1 = pnand %p959_p0, %p1184_p8 }
 0x2bf   : > { %p957_p2 = pneg %p956_p1 }
 0x2c1   : > { %1065 = dma.done.wait (%p957_p2), %s847_s21, 512  }
 0x2c2   : > { %1067 = vsyncadd (%p957_p2), %s847_s21, 4294966784  ;;  %s20_s29 = sadd.s32 1, %s1090_s29   ;;  %s1393_s24 = smov %s1074_s25 }
 0x2c3   : > { %p17_p3 = scmp.ge.s32.totalorder %s20_s29, 4   ;;  %s1394_s25 = smov %s1078_s26 }
 0x2c4   : > { %s1395_s26 = smov %s1190_s14  ;;  %s1396_s27 = smov %s1086_s28 }
 0x2c5   : > { %s1397_s28 = smov %s1399_s9  ;;  %19 = sbr.rel (!%p17_p3) target bundleno = 4 (0x4), region = 83 }
 0x2ca   :  { %852 = vsyncpa [#allocation3], 1 }
 0x2cb   :  { %854 = vsyncpa [#allocation3 + $0x1], 1 }

</bundles_post_ra>
